<compile_context>
chip_gen: v5e
topology: v5e:2x2
jax: 0.10.0
libtpu: 0.0.40
codegen_flags: <defaults>
</compile_context>

<pallas_src>
import functools

import jax
import jax.numpy as jnp
from jax.experimental import pallas as pl
from jax.experimental.pallas import tpu as pltpu

_LANES = 128  # lane width used for in-VMEM layer-3 math


def _round_up(n, m):
    return ((n + m - 1) // m) * m


def _choose_tile(batch, block_b):
    """Pick (tile_rows, grid, padded_batch).

    - tile rows are a multiple of 8 (sublane granularity)
    - at least 2 grid steps whenever the batch allows it (v7x: 2 TensorCores)
    - padding waste bounded to < 1 tile of the *derived* size, not block_b.
    """
    pad8 = _round_up(max(int(batch), 1), 8)
    n_steps = max(pl.cdiv(pad8, block_b), min(2, pad8 // 8), 1)
    tb = _round_up(pl.cdiv(pad8, n_steps), 8)
    grid = pl.cdiv(pad8, tb)
    pad_b = grid * tb
    return tb, grid, pad_b


def qnet_kernel(x_ref, w1_ref, b1_ref, w2_ref, b2_ref, w3_ref, b3_ref, o_ref,
                *, action_size):
    x = x_ref[...]                                   # (tb, 4)   f32
    w1 = w1_ref[...].astype(jnp.float32)             # (4, 128)  bf16 -> f32

    # Layer 1 on the VPU: K=4 is too small to be worth an MXU pass. f32 math
    # (v5e has no bf16 VPU; also keeps the MXU free for layers 2/3).
    h1 = b1_ref[...] + x[:, 0:1] * w1[0:1, :]
    for k in range(1, 4):
        h1 = h1 + x[:, k:k + 1] * w1[k:k + 1, :]
    h1 = jnp.maximum(h1, 0.0)                        # (tb, 128) f32

    # Layer 2 on the MXU: bf16 inputs, f32 accumulation.
    h2 = jnp.dot(h1.astype(jnp.bfloat16), w2_ref[...],
                 preferred_element_type=jnp.float32)
    h2 = jnp.maximum(h2 + b2_ref[...], 0.0)          # (tb, 128) f32

    # Layer 3: lane-dense (multiple-of-128) math in VMEM ...
    out = jnp.dot(h2.astype(jnp.bfloat16), w3_ref[...],
                  preferred_element_type=jnp.float32)
    out = out + b3_ref[...]                          # (tb, out_lanes) f32
    # ... but only the useful action_size columns are written back to HBM
    # (the padded columns are guaranteed zeros nobody reads).
    o_ref[...] = out[:, :action_size]


def prepare_qnet_params(params):
    """One-time weight prep: bf16 casts + lane padding. Call once, reuse."""
    w1, b1, w2, b2, w3, b3 = params
    action_size = w3.shape[1]
    out_lanes = _round_up(action_size, _LANES)

    w1b = w1.astype(jnp.bfloat16)                    # (4, 128)
    w2b = w2.astype(jnp.bfloat16)                    # (128, 128)
    w3p = jnp.zeros((w3.shape[0], out_lanes), jnp.bfloat16)
    w3p = w3p.at[:, :action_size].set(w3.astype(jnp.bfloat16))
    b3p = jnp.zeros((1, out_lanes), jnp.float32)
    b3p = b3p.at[:, :action_size].set(jnp.reshape(b3, (1, -1)))

    return (w1b, jnp.reshape(b1, (1, -1)).astype(jnp.float32),
            w2b, jnp.reshape(b2, (1, -1)).astype(jnp.float32),
            w3p, b3p)


def qnet_forward(x, prepared_params, *, action_size, block_b=2048):
    """Forward pass. `prepared_params` comes from prepare_qnet_params()."""
    w1b, b1, w2b, b2, w3p, b3p = prepared_params
    batch = x.shape[0]

    tb, grid, pad_b = _choose_tile(batch, block_b)
    xp = x if pad_b == batch else jnp.pad(x, ((0, pad_b - batch), (0, 0)))

    def const_spec(a):
        # Constant index_map: weights/biases stay VMEM-resident across steps.
        return pl.BlockSpec(a.shape, lambda i: (0,) * a.ndim)

    kernel = functools.partial(qnet_kernel, action_size=action_size)

    out = pl.pallas_call(
        kernel,
        out_shape=jax.ShapeDtypeStruct((pad_b, action_size), jnp.float32),
        grid=(grid,),
        in_specs=[
            pl.BlockSpec((tb, 4), lambda i: (i, 0)),      # x: blocked on batch
            const_spec(w1b), const_spec(b1),
            const_spec(w2b), const_spec(b2),
            const_spec(w3p), const_spec(b3p),
        ],
        out_specs=pl.BlockSpec((tb, action_size), lambda i: (i, 0)),
        compiler_params=pltpu.CompilerParams(
            dimension_semantics=("parallel",)),           # shard batch across TCs
    )(xp, w1b, b1, w2b, b2, w3p, b3p)

    return out if pad_b == batch else out[:batch]


def init_qnet_params(key, action_size):
    """Deterministic init mimicking torch.nn.Linear default (uniform +-1/sqrt(fan_in))."""
    def linear(key, fan_in, fan_out):
        kw, kb = jax.random.split(key)
        bound = 1.0 / jnp.sqrt(jnp.float32(fan_in))
        # stored as (in, out) so forward is x @ W + b
        w = jax.random.uniform(kw, (fan_in, fan_out), jnp.float32, -bound, bound)
        b = jax.random.uniform(kb, (1, fan_out), jnp.float32, -bound, bound)
        return w, b

    k1, k2, k3 = jax.random.split(key, 3)
    w1, b1 = linear(k1, 4, 128)
    w2, b2 = linear(k2, 128, 128)
    w3, b3 = linear(k3, 128, action_size)
    return (w1, b1, w2, b2, w3, b3)


def qnet_reference(x, params):
    """Plain-JAX reference mirroring the kernel's bf16 weight/activation casts."""
    w1, b1, w2, b2, w3, b3 = params
    bf = lambda a: a.astype(jnp.bfloat16).astype(jnp.float32)
    h = jax.nn.relu(x @ bf(w1) + b1)
    h = jax.nn.relu(bf(h) @ bf(w2) + b2)
    return bf(h) @ bf(w3) + b3


if __name__ == "__main__":
    key = jax.random.PRNGKey(0)
    k_params, k_x = jax.random.split(key)

    batch = 13          # exercises padding (->16) and a 2-step grid
    action_size = 2     # e.g. CartPole-style discrete action space

    params = init_qnet_params(k_params, action_size)
    prepped = prepare_qnet_params(params)          # one-time weight prep
    x = jax.random.normal(k_x, (batch, 4), jnp.float32)

    fwd = jax.jit(functools.partial(qnet_forward, action_size=action_size))
    out = jax.block_until_ready(fwd(x, prepped))

    ref = qnet_reference(x, params)
    assert out.shape == (batch, action_size), out.shape
    assert jnp.allclose(out, ref, atol=2e-2, rtol=2e-2), (
        float(jnp.max(jnp.abs(out - ref))))

    print("KERNEL_OK")
</pallas_src>

<mosaic_0001>
module attributes {stable_mosaic.version = 11 : i64} {
  func.func @qnet_kernel(%arg0: i32, %arg1: memref<8x4xf32, #tpu.memory_space<vmem>>, %arg2: memref<4x128xbf16, #tpu.memory_space<vmem>>, %arg3: memref<1x128xf32, #tpu.memory_space<vmem>>, %arg4: memref<128x128xbf16, #tpu.memory_space<vmem>>, %arg5: memref<1x128xf32, #tpu.memory_space<vmem>>, %arg6: memref<128x128xbf16, #tpu.memory_space<vmem>>, %arg7: memref<1x128xf32, #tpu.memory_space<vmem>>, %arg8: memref<8x2xf32, #tpu.memory_space<vmem>>) attributes {dimension_semantics = [#tpu.dimension_semantics<parallel>], iteration_bounds = array<i64: 2>, scalar_prefetch = 0 : i64, scratch_operands = 0 : i64, tpu.core_type = #tpu.core_type<tc>, window_params = [{transform_indices = @transform_0, window_bounds = array<i64: 8, 4>}, {pipeline_mode = #tpu.pipeline_mode<synchronous>, transform_indices = @transform_1, window_bounds = array<i64: 4, 128>}, {pipeline_mode = #tpu.pipeline_mode<synchronous>, transform_indices = @transform_2, window_bounds = array<i64: 1, 128>}, {pipeline_mode = #tpu.pipeline_mode<synchronous>, transform_indices = @transform_3, window_bounds = array<i64: 128, 128>}, {pipeline_mode = #tpu.pipeline_mode<synchronous>, transform_indices = @transform_4, window_bounds = array<i64: 1, 128>}, {pipeline_mode = #tpu.pipeline_mode<synchronous>, transform_indices = @transform_5, window_bounds = array<i64: 128, 128>}, {pipeline_mode = #tpu.pipeline_mode<synchronous>, transform_indices = @transform_6, window_bounds = array<i64: 1, 128>}, {transform_indices = @transform_7, window_bounds = array<i64: 8, 2>}]} {
    %c0 = arith.constant 0 : index
    %c0_0 = arith.constant 0 : index
    %0 = vector.load %arg1[%c0, %c0_0] : memref<8x4xf32, #tpu.memory_space<vmem>>, vector<8x4xf32>
    %c0_1 = arith.constant 0 : index
    %c0_2 = arith.constant 0 : index
    %1 = vector.load %arg2[%c0_1, %c0_2] : memref<4x128xbf16, #tpu.memory_space<vmem>>, vector<4x128xbf16>
    %2 = arith.extf %1 : vector<4x128xbf16> to vector<4x128xf32>
    %c0_3 = arith.constant 0 : index
    %c0_4 = arith.constant 0 : index
    %3 = vector.load %arg3[%c0_3, %c0_4] : memref<1x128xf32, #tpu.memory_space<vmem>>, vector<1x128xf32>
    %4 = vector.extract_strided_slice %0 {offsets = [0, 0], sizes = [8, 1], strides = [1, 1]} : vector<8x4xf32> to vector<8x1xf32>
    %5 = vector.extract_strided_slice %2 {offsets = [0, 0], sizes = [1, 128], strides = [1, 1]} : vector<4x128xf32> to vector<1x128xf32>
    %6 = vector.broadcast %4 : vector<8x1xf32> to vector<8x128xf32>
    %7 = vector.broadcast %5 : vector<1x128xf32> to vector<8x128xf32>
    %8 = arith.mulf %6, %7 : vector<8x128xf32>
    %9 = vector.broadcast %3 : vector<1x128xf32> to vector<8x128xf32>
    %10 = arith.addf %9, %8 : vector<8x128xf32>
    %11 = vector.extract_strided_slice %0 {offsets = [0, 1], sizes = [8, 1], strides = [1, 1]} : vector<8x4xf32> to vector<8x1xf32>
    %12 = vector.extract_strided_slice %2 {offsets = [1, 0], sizes = [1, 128], strides = [1, 1]} : vector<4x128xf32> to vector<1x128xf32>
    %13 = vector.broadcast %11 : vector<8x1xf32> to vector<8x128xf32>
    %14 = vector.broadcast %12 : vector<1x128xf32> to vector<8x128xf32>
    %15 = arith.mulf %13, %14 : vector<8x128xf32>
    %16 = arith.addf %10, %15 : vector<8x128xf32>
    %17 = vector.extract_strided_slice %0 {offsets = [0, 2], sizes = [8, 1], strides = [1, 1]} : vector<8x4xf32> to vector<8x1xf32>
    %18 = vector.extract_strided_slice %2 {offsets = [2, 0], sizes = [1, 128], strides = [1, 1]} : vector<4x128xf32> to vector<1x128xf32>
    %19 = vector.broadcast %17 : vector<8x1xf32> to vector<8x128xf32>
    %20 = vector.broadcast %18 : vector<1x128xf32> to vector<8x128xf32>
    %21 = arith.mulf %19, %20 : vector<8x128xf32>
    %22 = arith.addf %16, %21 : vector<8x128xf32>
    %23 = vector.extract_strided_slice %0 {offsets = [0, 3], sizes = [8, 1], strides = [1, 1]} : vector<8x4xf32> to vector<8x1xf32>
    %24 = vector.extract_strided_slice %2 {offsets = [3, 0], sizes = [1, 128], strides = [1, 1]} : vector<4x128xf32> to vector<1x128xf32>
    %25 = vector.broadcast %23 : vector<8x1xf32> to vector<8x128xf32>
    %26 = vector.broadcast %24 : vector<1x128xf32> to vector<8x128xf32>
    %27 = arith.mulf %25, %26 : vector<8x128xf32>
    %28 = arith.addf %22, %27 : vector<8x128xf32>
    %cst = arith.constant 0.000000e+00 : f32
    %29 = vector.broadcast %cst : f32 to vector<8x128xf32>
    %30 = arith.maximumf %28, %29 : vector<8x128xf32>
    %31 = arith.truncf %30 : vector<8x128xf32> to vector<8x128xbf16>
    %c0_5 = arith.constant 0 : index
    %c0_6 = arith.constant 0 : index
    %32 = vector.load %arg4[%c0_5, %c0_6] : memref<128x128xbf16, #tpu.memory_space<vmem>>, vector<128x128xbf16>
    %cst_7 = arith.constant dense<0.000000e+00> : vector<8x128xf32>
    %33 = tpu.matmul %31, %32, %cst_7 {dimension_numbers = #tpu.dot_dimension_numbers<[1], [0], [0], [1], [0, 0, 1, 1], [], []>} : vector<8x128xbf16>, vector<128x128xbf16>, vector<8x128xf32> -> vector<8x128xf32>
    %c0_8 = arith.constant 0 : index
    %c0_9 = arith.constant 0 : index
    %34 = vector.load %arg5[%c0_8, %c0_9] : memref<1x128xf32, #tpu.memory_space<vmem>>, vector<1x128xf32>
    %35 = vector.broadcast %34 : vector<1x128xf32> to vector<8x128xf32>
    %36 = arith.addf %33, %35 : vector<8x128xf32>
    %cst_10 = arith.constant 0.000000e+00 : f32
    %37 = vector.broadcast %cst_10 : f32 to vector<8x128xf32>
    %38 = arith.maximumf %36, %37 : vector<8x128xf32>
    %39 = arith.truncf %38 : vector<8x128xf32> to vector<8x128xbf16>
    %c0_11 = arith.constant 0 : index
    %c0_12 = arith.constant 0 : index
    %40 = vector.load %arg6[%c0_11, %c0_12] : memref<128x128xbf16, #tpu.memory_space<vmem>>, vector<128x128xbf16>
    %cst_13 = arith.constant dense<0.000000e+00> : vector<8x128xf32>
    %41 = tpu.matmul %39, %40, %cst_13 {dimension_numbers = #tpu.dot_dimension_numbers<[1], [0], [0], [1], [0, 0, 1, 1], [], []>} : vector<8x128xbf16>, vector<128x128xbf16>, vector<8x128xf32> -> vector<8x128xf32>
    %c0_14 = arith.constant 0 : index
    %c0_15 = arith.constant 0 : index
    %42 = vector.load %arg7[%c0_14, %c0_15] : memref<1x128xf32, #tpu.memory_space<vmem>>, vector<1x128xf32>
    %43 = vector.broadcast %42 : vector<1x128xf32> to vector<8x128xf32>
    %44 = arith.addf %41, %43 : vector<8x128xf32>
    %45 = vector.extract_strided_slice %44 {offsets = [0, 0], sizes = [8, 2], strides = [1, 1]} : vector<8x128xf32> to vector<8x2xf32>
    %c0_16 = arith.constant 0 : index
    %c0_17 = arith.constant 0 : index
    %46 = vector.load %arg8[%c0_16, %c0_17] : memref<8x2xf32, #tpu.memory_space<vmem>>, vector<8x2xf32>
    tpu.vector_store %arg8[%c0_16, %c0_17], %45 {strides = array<i32>} : memref<8x2xf32, #tpu.memory_space<vmem>>, vector<8x2xf32>,
    return
  }
  func.func @transform_0(%arg0: i32) -> (i32, i32) {
    %c0_i32 = arith.constant 0 : i32
    %c0_i32_0 = arith.constant 0 : i32
    return %arg0, %c0_i32 : i32, i32
  }
  func.func @transform_1(%arg0: i32) -> (i32, i32) {
    %c0_i32 = arith.constant 0 : i32
    %c0_i32_0 = arith.constant 0 : i32
    %c0_i32_1 = arith.constant 0 : i32
    return %c0_i32, %c0_i32_0 : i32, i32
  }
  func.func @transform_2(%arg0: i32) -> (i32, i32) {
    %c0_i32 = arith.constant 0 : i32
    %c0_i32_0 = arith.constant 0 : i32
    %c0_i32_1 = arith.constant 0 : i32
    return %c0_i32, %c0_i32_0 : i32, i32
  }
  func.func @transform_3(%arg0: i32) -> (i32, i32) {
    %c0_i32 = arith.constant 0 : i32
    %c0_i32_0 = arith.constant 0 : i32
    %c0_i32_1 = arith.constant 0 : i32
    return %c0_i32, %c0_i32_0 : i32, i32
  }
  func.func @transform_4(%arg0: i32) -> (i32, i32) {
    %c0_i32 = arith.constant 0 : i32
    %c0_i32_0 = arith.constant 0 : i32
    %c0_i32_1 = arith.constant 0 : i32
    return %c0_i32, %c0_i32_0 : i32, i32
  }
  func.func @transform_5(%arg0: i32) -> (i32, i32) {
    %c0_i32 = arith.constant 0 : i32
    %c0_i32_0 = arith.constant 0 : i32
    %c0_i32_1 = arith.constant 0 : i32
    return %c0_i32, %c0_i32_0 : i32, i32
  }
  func.func @transform_6(%arg0: i32) -> (i32, i32) {
    %c0_i32 = arith.constant 0 : i32
    %c0_i32_0 = arith.constant 0 : i32
    %c0_i32_1 = arith.constant 0 : i32
    return %c0_i32, %c0_i32_0 : i32, i32
  }
  func.func @transform_7(%arg0: i32) -> (i32, i32) {
    %c0_i32 = arith.constant 0 : i32
    %c0_i32_0 = arith.constant 0 : i32
    return %arg0, %c0_i32 : i32, i32
  }
}

</mosaic_0001>

<bundles_post_ra>
// kernel: qnet_forward.1
= control target key start
LH: loop header
LB: loop body
LE: loop exit
PB: predicated region body
PF: predicated region fallthrough
CT: control target
= control target key end

     0   :  { %12 = vsyncpa [#allocation3], 0  ;;  %s912_s0 = inlined_call_operand.vmem [shape: f32[16,4], index: 0, kind: input, shape index: {}]   ;;  %s913_s1 = inlined_call_operand.vmem [shape: bf16[4,128], index: 1, kind: input, shape index: {}]   ;;  %s914_s2 = inlined_call_operand.vmem [shape: f32[1,128], index: 2, kind: input, shape index: {}]   ;;  %s915_s3 = inlined_call_operand.hbm [shape: bf16[128,128], index: 3, kind: input, shape index: {}]   ;;  %s916_s4 = inlined_call_operand.vmem [shape: f32[1,128], index: 4, kind: input, shape index: {}]   ;;  %s917_s5 = inlined_call_operand.hbm [shape: bf16[128,128], index: 5, kind: input, shape index: {}]   ;;  %s918_s6 = inlined_call_operand.vmem [shape: f32[1,128], index: 6, kind: input, shape index: {}]   ;;  %s919_s7 = inlined_call_operand.vmem [shape: f32[16,2], index: 7, kind: output, shape index: {}]  }
   0x1   :  { %13 = vsyncpa [#allocation5], 0  ;;  %s847_s24 = smov 0  }
   0x2 LB: > { %s219_s27 = sshll.u32 %s915_s3, 4  ;;  %s856_s28 = sadd.s32 4294967295, %s797_s24   ;;  %s797_s24 = sphi %s847_s24, %s19_s24   ;;  %s220_s27 = int_to_ptr.hbm [resolvable:$true] %s219_s27 }
   0x3   : > { %p589_p0 = scmp.ge.s32.totalorder %s797_s24, 1  ;;  %p202_p1 = scmp.lt.s32.totalorder %s797_s24, 3 }
   0x4   : > { %p695_p2 = scmp.eq.s32.totalorder %s856_s28, 0  ;;  %s799_s30 = smov [#allocation2]  }
   0x5   : > { %p861_p3 = pnand %p589_p0, %p202_p1  ;;  %s221_s8 = sshll.u32 %s799_s30, 4  ;;  %s222_s8 = int_to_ptr.vmem [resolvable:$true] %s221_s8 }
   0x6   : > { %s236_s11 = sshll.u32 %s917_s5, 4  ;;  %s800_s12 = smov [#allocation4]   ;;  %s237_s11 = int_to_ptr.hbm [resolvable:$true] %s236_s11 }
   0x7   : > { %p688_p4 = pneg %p861_p3  ;;  %s238_s13 = sshll.u32 %s800_s12, 4  ;;  %s239_s13 = int_to_ptr.vmem [resolvable:$true] %s238_s13 }
   0x8   : > { %s801_s14 = smov 64   ;;  %s802_s15 = smov 4  }
   0x9   : > { %p689_p5 = pnand %p695_p2, %p688_p4  ;;  %264 = sbr.rel (%p861_p3) target bundleno = 425 (0x1a9), region = 48 }
   0xb   : > { %691 = dma.hbm_to_vmem [thread:$0]  (!%p689_p5), %s220_s27, 1024, %s222_s8, [#allocation3], %s801_s14, %s801_s14, %s802_s15  }
   0xc   : > { %694 = dma.hbm_to_vmem [thread:$0]  (!%p689_p5), %s237_s11, 1024, %s239_s13, [#allocation5], %s801_s14, %s801_s14, %s802_s15  }
   0xe   : > { %788 = dma.done.wait (%p695_p2), [#allocation3], 1024  }
   0xf   : > { %790 = vsyncadd (%p695_p2), [#allocation3], 4294966272 }
  0x10   : > { %792 = dma.done.wait (%p695_p2), [#allocation5], 1024  }
  0x11   : > { %794 = vsyncadd (%p695_p2), [#allocation5], 4294966272  ;;  %p300_p6 = scmp.lt.s32.totalorder %s856_s28, 1  ;;  %v803_v0 = vmov 0   ;;  %v804_v1 = vmov 2   ;;  %v671_v3 = vld [vmem:[#allocation2 + $0x38] sm:$0xff] }
  0x12   : > { %715 = vset.pattern.permute.xlu0 %v803_v0  ;;  %717 = vset.pattern.permute.xlu1 %v804_v1  ;;  %v670_v4 = vld [vmem:[#allocation2 + $0x30] sm:$0xff]  ;;  %v669_v5 = vld [vmem:[#allocation2 + $0x28] sm:$0xff]  ;;  %v805_v6 = vmov 1   ;;  %v806_v7 = vmov 3   ;;  %v668_v8 = vld [vmem:[#allocation2 + $0x20] sm:$0xff]  ;;  %vm510_vm0 = vcmask 15360  }
  0x13   : > { %s922_s28 = smov (!%p300_p6, %s856_s28), 1  ;;  %414 = vmatpush.bf16.msra.mxu0 %v671_v3  ;;  %v667_v9 = vld [vmem:[#allocation2 + $0x18] sm:$0xff]  ;;  %v666_v10 = vld [vmem:[#allocation2 + $0x10] sm:$0xff]  ;;  %v665_v11 = vld [vmem:[#allocation2 + $0x8] sm:$0xff] }
  0x14   : > { %s596_s16 = sshll.u32 %s922_s28, 3  ;;  %v664_v12 = vld [vmem:[#allocation2] sm:$0xff]  ;;  %v679_v13 = vld [vmem:[#allocation4 + $0x38] sm:$0xff]  ;;  %v678_v14 = vld [vmem:[#allocation4 + $0x30] sm:$0xff] }
  0x15   : > { %s303_s19 = scalar_lea.vmem %s912_s0, %s596_s16  ;;  %497 = vmatpush.bf16.msra.mxu1 %v679_v13  ;;  %v309_v15 = vld [vmem:[%s913_s1] sm:$0x3]  ;;  %v677_v16 = vld [vmem:[#allocation4 + $0x28] sm:$0xff]  ;;  %v675_v22 = vld [vmem:[#allocation4 + $0x18] sm:$0xff]  ;;  %s307_s9 = scalar_lea.vmem %s919_s7, %s596_s16 }
  0x16   : > { %v308_v2 = vld [vmem:[%s303_s19] sm:$0xff]  ;;  %v310_v17 = vunpack.c.l.bf16 %v309_v15  ;;  %v674_v28 = vld [vmem:[#allocation4 + $0x10] sm:$0xff]  ;;  %v673_v40 = vld [vmem:[#allocation4 + $0x8] sm:$0xff] }
  0x17   : > { %314 = vperm.xlu0 %715, %v308_v2   ;;  %331 = vperm.xlu1 %717, %v308_v2   ;;  %v676_v20 = vld [vmem:[#allocation4 + $0x20] sm:$0xff] }
  0x18   : > { %415 = vmatpush.bf16.msra.mxu0 %v670_v4  ;;  %v317_v21 = vperm.slane %v310_v17, 0  ;;  %v720_v23 = vld [vmem:[%s914_s2] ss:$0 sm:$0xff]  ;;  %v327_v25 = vperm.slane %v310_v17, 1  ;;  %v334_v26 = vperm.slane %v310_v17, 2  ;;  %v341_v27 = vperm.slane %v310_v17, 3 }
  0x19   : > { %498 = vmatpush.bf16.msra.mxu1 %v678_v14  ;;  %v672_v41 = vld [vmem:[#allocation4] sm:$0xff] }
  0x1a   : > { %v721_v42 = vld [vmem:[%s916_s4] ss:$0 sm:$0xff] }
  0x1b   : > { %v722_v48 = vld [vmem:[%s918_s6] ss:$0 sm:$0xff] }
  0x1c   : > { %416 = vmatpush.bf16.msra.mxu0 %v669_v5 }
  0x1d   : > { %499 = vmatpush.bf16.msra.mxu1 %v677_v16 }
  0x1f   : > { %716 = vset.pattern.permute.xlu0 %v805_v6  ;;  %718 = vset.pattern.permute.xlu1 %v806_v7 }
  0x20   : > { %324 = vperm.xlu0 %716, %v308_v2   ;;  %338 = vperm.xlu1 %718, %v308_v2  }
  0x21   : > { %417 = vmatpush.bf16.msra.mxu0 %v668_v8  ;;  %500 = vmatpush.bf16.msra.mxu1 %v676_v20 }
  0x25   : > { %418 = vmatpush.bf16.msra.mxu0 %v667_v9  ;;  %501 = vmatpush.bf16.msra.mxu1 %v675_v22 }
  0x28   : > { %719 = vset.pattern.permute.xlu0 %v806_v7 }
  0x29   : > { %419 = vmatpush.bf16.msra.mxu0 %v666_v10  ;;  %502 = vmatpush.bf16.msra.mxu1 %v674_v28 }
  0x2d   : > { %420 = vmatpush.bf16.msra.mxu0 %v665_v11  ;;  %503 = vmatpush.bf16.msra.mxu1 %v673_v40 }
  0x31   : > { %421 = vmatpush.bf16.msra.mxu0 %v664_v12  ;;  %504 = vmatpush.bf16.msra.mxu1 %v672_v41 }
  0x89   : > { %v315_v18 = vpop.permute.xlu0 %314  ;;  %v332_v19 = vpop.permute.xlu1 %331 }
  0x8a   : > { %v318_v24 = vmul.f32 %v317_v21, %v315_v18  ;;  %v335_v33 = vmul.f32 %v334_v26, %v332_v19 }
  0x8c   : > { %v322_v31 = vadd.f32 %v720_v23, %v318_v24 }
  0x92   : > { %v325_v29 = vpop.permute.xlu0 %324  ;;  %v339_v30 = vpop.permute.xlu1 %338 }
  0x93   : > { %v328_v32 = vmul.f32 %v327_v25, %v325_v29  ;;  %v342_v35 = vmul.f32 %v341_v27, %v339_v30 }
  0x95   : > { %v329_v34 = vadd.f32 %v328_v32, %v322_v31 }
  0x97   : > { %v336_v36 = vadd.f32 %v335_v33, %v329_v34 }
  0x99   : > { %v343_v37 = vadd.f32 %v342_v35, %v336_v36 }
  0x9b   : > { %v344_v38 = vmax.f32 %v343_v37, 0.0 }
  0x9d   : > { %v345_v39 = vpack.c.bf16 %v344_v38, %v344_v38 }
  0x9f   : > { %422 = vmatmul.bf16.vlgmr.msra.gmra.mxu0 %v345_v39 }
 0x11c   : > { %v423_v43 = vpop.f32.mrf.mxu0 }
 0x11d   : > { %v424_v44 = vadd.f32 %v721_v42, %v423_v43 }
 0x11f   : > { %v427_v45 = vmax.f32 %v424_v44, 0.0 }
 0x121   : > { %v428_v46 = vpack.c.bf16 %v427_v45, %v427_v45 }
 0x123   : > { %505 = vmatmul.bf16.vlgmr.msra.gmra.mxu1 %v428_v46 }
 0x124   : > { %v425_v47 = vpop.f32.mrf.mxu0 }
 0x1a0   : > { %v506_v49 = vpop.f32.mrf.mxu1 }
 0x1a1   : > { %v507_v50 = vadd.f32 %v722_v48, %v506_v49 }
 0x1a3   : > { %511 = vst.msk [vmem:[%s307_s9] sm:$0xff] %vm510_vm0, %v507_v50 }
 0x1a8   : > { %v508_v51 = vpop.f32.mrf.mxu1 }
 0x1a9 PF: > { %s19_s24 = sadd.s32 1, %s797_s24  }
 0x1aa   : > { %p16_p7 = scmp.ge.s32.totalorder %s19_s24, 4  }
 0x1ac   :  { %18 = sbr.rel (!%p16_p7) target bundleno = 2 (0x2), region = 87 }
 0x1b1   :  { %531 = vsyncpa [#allocation3], 1 }
 0x1b2   :  { %533 = vsyncpa [#allocation3 + $0x1], 1 }
 0x1b3   :  { %534 = vsyncpa [#allocation5], 1 }

</bundles_post_ra>
